<compile_context>
chip_gen: v7x
topology: tpu7x:2x2x1
jax: 0.10.0
libtpu: 0.0.40
codegen_flags: <defaults>
</compile_context>

<pallas_src>
from functools import partial

import numpy as np
import jax
import jax.numpy as jnp
from jax import lax
from jax.experimental import pallas as pl
from jax.experimental.pallas import tpu as pltpu

# ----- configuration (stand-in for `prms`) ----------------------------------
TREE_DEPTH = 3                   # prms.tree_depth
FEATURE_LENGTH = 32              # prms.feature_length
FEATURES4TREE = 8                # prms.features4tree (unused in forward)
N_LEAF = 2 ** TREE_DEPTH         # 8 decision nodes / leaves
OUT_W = 2 ** (TREE_DEPTH + 1)    # 16 output width
BATCH = 512                      # 2 x 256-row tiles -> two parallel grid steps


# ----- fixed routing matrices (host-side, numpy) -----------------------------
def build_routing_matrices(depth):
    """M   : (n_leaf, depth*n_leaf) signed decision gather. Column c=(n-1)*L+leaf picks
             +feats[node] (left branch) or -feats[node] (right), so sigmoid(feats @ M)
             yields d or 1-d directly.
       Q   : (depth*n_leaf, out_w) scatter of every layer's per-leaf path probability
             into its big_mu segment (all depth layers fused into one matmul).
       init: (out_w,) the `[1, 1, 0, ...]` big_mu initialisation."""
    L = 2 ** depth
    out_w = 2 ** (depth + 1)
    M = np.zeros((L, depth * L), np.float32)
    Q = np.zeros((depth * L, out_w), np.float32)
    init = np.zeros((out_w,), np.float32)
    init[0] = init[1] = 1.0
    for n in range(1, depth + 1):
        off = 2 ** n                                          # segment start in big_mu
        for leaf in range(L):
            node = 2 ** (n - 1) + (leaf >> (depth - n + 1))   # heap index of ancestor
            bit = (leaf >> (depth - n)) & 1                   # 0 = left, 1 = right
            M[node, (n - 1) * L + leaf] = 1.0 - 2.0 * bit     # +feats or -feats
        for i in range(2 ** n):
            Q[(n - 1) * L + (i << (depth - n)), off + i] = 1.0
    return M, Q, init


# ----- kernel ----------------------------------------------------------------
def tree_kernel(x_ref, w2t_ref, q2t_ref, init_ref, o_ref, *, depth, n_leaf):
    # x_ref   : (TB, F)            batch tile, natural layout (batch on sublanes)
    # w2t_ref : (depth*L, F)       fused (one-hot select x signed gather)^T
    # q2t_ref : (OUT_W, depth*L)   fused layer->big_mu scatter, transposed
    # init_ref: (OUT_W, 1)         big_mu init column ([1,1,0,...]^T)
    # o_ref   : (OUT_W, TB)        transposed output tile: batch on lanes -> dense vst
    # feats^T = W2^T @ x^T, expressed as a dot_general contracting on F (no transpose op).
    feats_t = lax.dot_general(
        w2t_ref[...], x_ref[...],
        dimension_numbers=(((1,), (1,)), ((), ())),
        preferred_element_type=jnp.float32)                   # (depth*L, TB) f32

    # Branch factor per (layer, leaf): sigmoid of the signed gathered feature.
    # exp + the reciprocal of the divide route to the EUP slot; VALU stays light.
    fact_t = 1.0 / (1.0 + jnp.exp(-feats_t))

    # Cumulative path probabilities per layer (sublane-aligned slices, lane-dense rows).
    mu = fact_t[0:n_leaf, :]
    mus = [mu]
    for n in range(1, depth):
        mu = mu * fact_t[n * n_leaf:(n + 1) * n_leaf, :]
        mus.append(mu)
    mu_all = jnp.concatenate(mus, axis=0) if depth > 1 else mus[0]   # (depth*L, TB)

    # Single scatter matmul + constant init; full-width (OUT_W, TB) store.
    out_t = init_ref[...] + jnp.dot(q2t_ref[...], mu_all,
                                    preferred_element_type=jnp.float32)
    o_ref[...] = out_t.astype(o_ref.dtype)


def _pick_batch_tile(batch):
    # Large tiles to amortize the ~0.35us/step pipeline overhead; >=2 steps when
    # possible so the 'parallel' grid axis can be split across v7x's two TCs.
    for tb in (2048, 1024, 512, 256):
        if batch % tb == 0 and batch // tb >= 2:
            return tb
    return batch      # small batch: whole thing in one invocation (no real grid)


# ----- wrapper ----------------------------------------------------------------
def tree_forward_pallas(x, feature_mask, depth, compute_dtype=jnp.float32):
    """Forward pass of `Tree`: returns big_mu of shape (B, 2**(depth+1)), f32."""
    B, F = x.shape
    L = 2 ** depth
    out_w = 2 ** (depth + 1)

    M, Q, init = build_routing_matrices(depth)
    # Fuse one-hot feature selection with the signed decision gather (exact: +/-1 entries).
    W2 = np.asarray(feature_mask, np.float32) @ M             # (F, depth*L)

    w2t = jnp.asarray(W2.T, compute_dtype)                    # (depth*L, F)
    q2t = jnp.asarray(Q.T, jnp.float32)                       # (out_w, depth*L)
    init_col = jnp.asarray(init.reshape(out_w, 1))            # (out_w, 1)
    x_in = jnp.asarray(x, compute_dtype)                      # bf16 option halves x DMA bytes

    tb = _pick_batch_tile(B)
    out_t = pl.pallas_call(
        partial(tree_kernel, depth=depth, n_leaf=L),
        out_shape=jax.ShapeDtypeStruct((out_w, B), jnp.float32),
        grid=(B // tb,),
        in_specs=[
            pl.BlockSpec((tb, F), lambda i: (i, 0)),
            pl.BlockSpec(w2t.shape, lambda i: (0, 0)),
            pl.BlockSpec(q2t.shape, lambda i: (0, 0)),
            pl.BlockSpec(init_col.shape, lambda i: (0, 0)),
        ],
        out_specs=pl.BlockSpec((out_w, tb), lambda i: (0, i)),
        compiler_params=pltpu.CompilerParams(dimension_semantics=("parallel",)),
    )(x_in, w2t, q2t, init_col)
    # Layout plumbing only: present the module's (B, out_w) orientation.
    return out_t.T


# ----- pure-JAX reference mirroring the PyTorch forward ----------------------
def tree_forward_ref(x, feature_mask, depth):
    B = x.shape[0]
    feats = x @ feature_mask
    d = (1.0 / (1.0 + jnp.exp(-feats)))[:, :, None]
    decision = jnp.concatenate([d, 1.0 - d], axis=2)          # (B, n_leaf, 2)
    mu = jnp.ones((B, 1, 1), x.dtype)
    big_mu = jnp.ones((B, 2, 1), x.dtype)
    begin, end = 1, 2
    for n in range(depth):
        mu = jnp.tile(mu, (1, 1, 2))
        mu = mu * decision[:, begin:end, :]
        begin, end = end, end + 2 ** (n + 1)
        mu = mu.reshape(B, -1, 1)
        big_mu = jnp.concatenate([big_mu, mu], axis=1)
    return big_mu.reshape(B, -1)


if __name__ == "__main__":
    # Deterministic parameter init (mirrors Tree.__init__ feature_mask).
    rng = np.random.default_rng(0)
    using_idx = rng.choice(FEATURE_LENGTH, N_LEAF, replace=True)
    feature_mask = np.eye(FEATURE_LENGTH, dtype=np.float32)[using_idx].T  # (F, n_leaf)

    x = jax.random.normal(jax.random.PRNGKey(0), (BATCH, FEATURE_LENGTH), jnp.float32)

    out = jax.block_until_ready(tree_forward_pallas(x, feature_mask, TREE_DEPTH))
    ref = jax.block_until_ready(tree_forward_ref(x, jnp.asarray(feature_mask), TREE_DEPTH))

    assert out.shape == (BATCH, OUT_W) and out.dtype == jnp.float32
    # 1 - sigmoid(z) is realised as sigmoid(-z); difference is O(1 ulp), well under atol.
    np.testing.assert_allclose(np.asarray(out), np.asarray(ref), rtol=1e-5, atol=1e-5)

    # bf16 input path (v6e/v7x perf option): halves x HBM traffic, f32 accumulation kept.
    out_bf16 = jax.block_until_ready(
        tree_forward_pallas(x, feature_mask, TREE_DEPTH, compute_dtype=jnp.bfloat16))
    np.testing.assert_allclose(np.asarray(out_bf16), np.asarray(ref), rtol=0, atol=5e-2)

    print("KERNEL_OK")
</pallas_src>

<mosaic_0001>
module attributes {stable_mosaic.version = 11 : i64} {
  func.func @tree_kernel(%arg0: i32, %arg1: memref<256x32xf32, #tpu.memory_space<vmem>>, %arg2: memref<24x32xf32, #tpu.memory_space<vmem>>, %arg3: memref<16x24xf32, #tpu.memory_space<vmem>>, %arg4: memref<16x1xf32, #tpu.memory_space<vmem>>, %arg5: memref<16x256xf32, #tpu.memory_space<vmem>>) attributes {dimension_semantics = [#tpu.dimension_semantics<parallel>], iteration_bounds = array<i64: 2>, scalar_prefetch = 0 : i64, scratch_operands = 0 : i64, tpu.core_type = #tpu.core_type<tc>, window_params = [{transform_indices = @transform_0, window_bounds = array<i64: 256, 32>}, {pipeline_mode = #tpu.pipeline_mode<synchronous>, transform_indices = @transform_1, window_bounds = array<i64: 24, 32>}, {pipeline_mode = #tpu.pipeline_mode<synchronous>, transform_indices = @transform_2, window_bounds = array<i64: 16, 24>}, {pipeline_mode = #tpu.pipeline_mode<synchronous>, transform_indices = @transform_3, window_bounds = array<i64: 16, 1>}, {transform_indices = @transform_4, window_bounds = array<i64: 16, 256>}]} {
    %c0 = arith.constant 0 : index
    %c0_0 = arith.constant 0 : index
    %0 = vector.load %arg2[%c0, %c0_0] : memref<24x32xf32, #tpu.memory_space<vmem>>, vector<24x32xf32>
    %c0_1 = arith.constant 0 : index
    %c0_2 = arith.constant 0 : index
    %1 = vector.load %arg1[%c0_1, %c0_2] : memref<256x32xf32, #tpu.memory_space<vmem>>, vector<256x32xf32>
    %cst = arith.constant dense<0.000000e+00> : vector<24x256xf32>
    %2 = tpu.matmul %0, %1, %cst {dimension_numbers = #tpu.dot_dimension_numbers<[1], [1], [0], [0], [0, 0, 1, 0], [], []>} : vector<24x32xf32>, vector<256x32xf32>, vector<24x256xf32> -> vector<24x256xf32>
    %cst_3 = arith.constant 0.000000e+00 : f32
    %3 = vector.broadcast %cst_3 : f32 to vector<24x256xf32>
    %4 = arith.subf %3, %2 : vector<24x256xf32>
    %5 = math.exp %4 : vector<24x256xf32>
    %cst_4 = arith.constant 1.000000e+00 : f32
    %6 = vector.broadcast %cst_4 : f32 to vector<24x256xf32>
    %7 = arith.addf %6, %5 : vector<24x256xf32>
    %cst_5 = arith.constant 1.000000e+00 : f32
    %8 = vector.broadcast %cst_5 : f32 to vector<24x256xf32>
    %9 = arith.divf %8, %7 : vector<24x256xf32>
    %10 = vector.extract_strided_slice %9 {offsets = [0, 0], sizes = [8, 256], strides = [1, 1]} : vector<24x256xf32> to vector<8x256xf32>
    %11 = vector.extract_strided_slice %9 {offsets = [8, 0], sizes = [8, 256], strides = [1, 1]} : vector<24x256xf32> to vector<8x256xf32>
    %12 = arith.mulf %10, %11 : vector<8x256xf32>
    %13 = vector.extract_strided_slice %9 {offsets = [16, 0], sizes = [8, 256], strides = [1, 1]} : vector<24x256xf32> to vector<8x256xf32>
    %14 = arith.mulf %12, %13 : vector<8x256xf32>
    %15 = tpu.concatenate %10, %12, %14 in 0 : vector<8x256xf32>, vector<8x256xf32>, vector<8x256xf32> -> vector<24x256xf32>
    %c0_6 = arith.constant 0 : index
    %c0_7 = arith.constant 0 : index
    %16 = vector.load %arg4[%c0_6, %c0_7] : memref<16x1xf32, #tpu.memory_space<vmem>>, vector<16x1xf32>
    %c0_8 = arith.constant 0 : index
    %c0_9 = arith.constant 0 : index
    %17 = vector.load %arg3[%c0_8, %c0_9] : memref<16x24xf32, #tpu.memory_space<vmem>>, vector<16x24xf32>
    %cst_10 = arith.constant dense<0.000000e+00> : vector<16x256xf32>
    %18 = tpu.matmul %17, %15, %cst_10 {dimension_numbers = #tpu.dot_dimension_numbers<[1], [0], [0], [1], [0, 0, 1, 1], [], []>} : vector<16x24xf32>, vector<24x256xf32>, vector<16x256xf32> -> vector<16x256xf32>
    %19 = vector.broadcast %16 : vector<16x1xf32> to vector<16x256xf32>
    %20 = arith.addf %19, %18 : vector<16x256xf32>
    %c0_11 = arith.constant 0 : index
    %c0_12 = arith.constant 0 : index
    %21 = vector.load %arg5[%c0_11, %c0_12] : memref<16x256xf32, #tpu.memory_space<vmem>>, vector<16x256xf32>
    tpu.vector_store %arg5[%c0_11, %c0_12], %20 {strides = array<i32>} : memref<16x256xf32, #tpu.memory_space<vmem>>, vector<16x256xf32>,
    return
  }
  func.func @transform_0(%arg0: i32) -> (i32, i32) {
    %c0_i32 = arith.constant 0 : i32
    %c0_i32_0 = arith.constant 0 : i32
    return %arg0, %c0_i32 : i32, i32
  }
  func.func @transform_1(%arg0: i32) -> (i32, i32) {
    %c0_i32 = arith.constant 0 : i32
    %c0_i32_0 = arith.constant 0 : i32
    %c0_i32_1 = arith.constant 0 : i32
    return %c0_i32, %c0_i32_0 : i32, i32
  }
  func.func @transform_2(%arg0: i32) -> (i32, i32) {
    %c0_i32 = arith.constant 0 : i32
    %c0_i32_0 = arith.constant 0 : i32
    %c0_i32_1 = arith.constant 0 : i32
    return %c0_i32, %c0_i32_0 : i32, i32
  }
  func.func @transform_3(%arg0: i32) -> (i32, i32) {
    %c0_i32 = arith.constant 0 : i32
    %c0_i32_0 = arith.constant 0 : i32
    %c0_i32_1 = arith.constant 0 : i32
    return %c0_i32, %c0_i32_0 : i32, i32
  }
  func.func @transform_4(%arg0: i32) -> (i32, i32) {
    %c0_i32 = arith.constant 0 : i32
    %c0_i32_0 = arith.constant 0 : i32
    return %c0_i32, %arg0 : i32, i32
  }
}

</mosaic_0001>

<bundles_post_ra>
// kernel: tpu_custom_call.1
= control target key start
LH: loop header
LB: loop body
LE: loop exit
PB: predicated region body
PF: predicated region fallthrough
CT: control target
= control target key end

     0   :  { %9 = vsyncpa [#allocation3], 0  ;;  %s1156_s0 = inlined_call_operand.vmem [shape: f32[512,32], index: 0, kind: input, shape index: {}]   ;;  %s1157_s1 = inlined_call_operand.vmem [shape: f32[24,32], index: 1, kind: input, shape index: {}]   ;;  %s1158_s2 = inlined_call_operand.vmem [shape: f32[16,24], index: 2, kind: input, shape index: {}]   ;;  %s1159_s3 = inlined_call_operand.vmem [shape: f32[16,1], index: 3, kind: input, shape index: {}]   ;;  %s1160_s4 = inlined_call_operand.hbm [shape: f32[16,512], index: 4, kind: output, shape index: {}]  }
   0x1   :  { %11 = vsyncpa [#allocation3 + $0x1], 0  ;;  %s949_s15 = smov 0   ;;  %s951_s16 = smov 0  }
   0x2   :  { %s953_s17 = smov 0   ;;  %s955_s18 = smov 0  }
   0x3 LB: > { %s970_s19 = sadd.s32 4294967295, %s916_s18   ;;  %s645_s20 = sadd.s32 4294967294, %s916_s18   ;;  %s916_s18 = sphi %s955_s18, %s1168_s18   ;;  %s912_s17 = sphi %s953_s17, %s1167_s17   ;;  %s908_s16 = sphi %s951_s16, %s1166_s16   ;;  %s904_s15 = sphi %s949_s15, %s1165_s15  }
   0x4   : > { %s974_s21 = sadd.s32 1, %s916_s18   ;;  %s113_s22 = sadd.s32 1, %s912_s17 }
   0x5   : > { %s110_s23 = ssub.s32 %s916_s18, %s974_s21  ;;  %p123_p0 = scmp.ne.s32.totalorder %s912_s17, %s908_s16 }
   0x6   : > { %p111_p1 = scmp.eq.s32.totalorder %s110_s23, 0  ;;  %p124_p2 = scmp.eq.s32.totalorder %s970_s19, 1 }
   0x7   : > { %p129_p3 = scmp.ne.s32.totalorder %s908_s16, %s904_s15  ;;  %p130_p4 = scmp.eq.s32.totalorder %s645_s20, 1 }
   0x8   : > { %s985_s24 = scalar_select %p111_p1, %s912_s17, %s113_s22  }
   0x9   : > { %p987_p5 = por %p124_p2, %p123_p0  ;;  %p991_p6 = por %p130_p4, %p129_p3 }
   0xa   : > { %p648_p7 = scmp.ge.s32.totalorder %s916_s18, 1  ;;  %p166_p8 = scmp.lt.s32.totalorder %s916_s18, 3 }
   0xc   : > { %p167_p9 = pnand %p648_p7, %p166_p8 }
   0xd   : > { %s650_s27 = sshll.u32 (!%p167_p9), %s970_s19, 5  ;;  %vm234_vm0 = vcmask (!%p167_p9), 261120   ;;  %v1001_v0 = vld [vmem:[%s1157_s1] sm:$0xff] (!%p167_p9)  ;;  %v200_v50 = vld [vmem:[%s1157_s1 + $0x8] sm:$0xff] (!%p167_p9)  ;;  %v201_v51 = vld [vmem:[%s1157_s1 + $0x10] sm:$0xff] (!%p167_p9)  ;;  %v918_v52 = vmov (!%p167_p9), 0.0  }
   0xe   : > { %170 = sbr.rel (%p167_p9) target bundleno = 581 (0x245), region = 36  ;;  %p193_p10 = scmp.lt.s32.totalorder (!%p167_p9), %s650_s27, 63  ;;  %727 = vmatprep.mubr.msk.f32.mxu0 (!%p167_p9), %vm234_vm0, %v1001_v0  ;;  %vm1012_vm1 = vmpackc.low (!%p167_p9), %vm234_vm0, %vm234_vm0  ;;  %538 = vmatprep.mubr.f32.mxu1 (!%p167_p9), %v918_v52  ;;  %v463_v53 = vld [vmem:[%s1159_s3] sm:$0xff] (!%p167_p9)  ;;  %v919_v54 = vmov (!%p167_p9), 0   ;;  %v464_v55 = vld [vmem:[%s1159_s3 + $0x8] sm:$0xff] (!%p167_p9)  ;;  %vm467_vm2 = vcmask (!%p167_p9), 195584  }
   0xf   : > { %829 = vset.pattern.permute.xlu0 (!%p167_p9), %v919_v54  ;;  %s189_s29 = sand.u32 (!%p167_p9), 1, %s908_s16   ;;  %s920_s12 = smov (!%p167_p9), [#allocation2]  }
  0x10   : > { %553 = vperm.xlu0 (!%p167_p9), %829, %v463_v53   ;;  %s858_s13 = sshll.u32 (!%p167_p9), %s920_s12, 4  ;;  %s859_s13 = int_to_ptr.vmem [resolvable:$false] %s858_s13 }
  0x11   : > { %s860_s14 = scalar_lea.vmem (!%p167_p9), %s859_s13, 1024 }
  0x14   : > { %558 = vperm.xlu0 (!%p167_p9), %829, %v464_v55  }
  0x15   : > { %s1170_s27 = smov (!%p193_p10, %s650_s27), 63 }
  0x16   : > { %s651_s30 = sshll.u32 %s1170_s27, 3 }
  0x17   : > { %s1008_s7 = scalar_lea.vmem %s1156_s0, %s651_s30  ;;  %s649_s30 = sshll.u32 %s189_s29, 5 }
  0x18   : > { %v218_v2 = vld [vmem:[%s1008_s7 + $0x80] sm:$0xff]  ;;  %v219_v3 = vld [vmem:[%s1008_s7 + $0x88] sm:$0xff]  ;;  %v220_v7 = vld [vmem:[%s1008_s7 + $0x90] sm:$0xff]  ;;  %s191_s5 = scalar_lea.vmem [#allocation2], %s649_s30 }
  0x19   : > { %v202_v4 = vld [vmem:[%s1008_s7] sm:$0xff]  ;;  %v733_v5 = vpack.c.bf16 %v219_v3, %v218_v2  ;;  %v203_v6 = vld [vmem:[%s1008_s7 + $0x8] sm:$0xff]  ;;  %v221_v8 = vld [vmem:[%s1008_s7 + $0x98] sm:$0xff]  ;;  %s583_s6 = sshll.u32 %s191_s5, 4  ;;  %s1108_s6 = int_to_ptr.vmem [resolvable:$true] %s583_s6 }
  0x1a   : > { %v736_v9 = vpack.c.bf16 %v203_v6, %v202_v4  ;;  %v739_v10 = vpack.c.bf16 %v221_v8, %v220_v7  ;;  %v204_v11 = vld [vmem:[%s1008_s7 + $0x10] sm:$0xff]  ;;  %v205_v12 = vld [vmem:[%s1008_s7 + $0x18] sm:$0xff]  ;;  %v222_v13 = vld [vmem:[%s1008_s7 + $0xa0] sm:$0xff]  ;;  %s854_s11 = scalar_lea.vmem %s1108_s6, 512  ;;  %p861_p0 = scmp.lt.s32.totalorder %s1108_s6, %s859_s13 }
  0x1b   : > { %735 = vmatprep.subr.msk.bf16.mxu0 %vm1012_vm1, %v733_v5  ;;  %v223_v14 = vld [vmem:[%s1008_s7 + $0xa8] sm:$0xff]  ;;  %v742_v15 = vpack.c.bf16 %v205_v12, %v204_v11  ;;  %v206_v17 = vld [vmem:[%s1008_s7 + $0x20] sm:$0xff]  ;;  %v224_v19 = vld [vmem:[%s1008_s7 + $0xb0] sm:$0xff]  ;;  %p855_p11 = scmp.ne.s32.totalorder %s1108_s6, %s854_s11  ;;  %p862_p1 = scmp.lt.s32.totalorder %s860_s14, %s854_s11 }
  0x1c   : > { %738 = vmatpush3.bf16.xpose.msk.msra.mxu0 %vm1012_vm1, %v736_v9  ;;  %v745_v16 = vpack.c.bf16 %v223_v14, %v222_v13  ;;  %v207_v18 = vld [vmem:[%s1008_s7 + $0x28] sm:$0xff]  ;;  %v225_v20 = vld [vmem:[%s1008_s7 + $0xb8] sm:$0xff]  ;;  %v208_v23 = vld [vmem:[%s1008_s7 + $0x30] sm:$0xff] }
  0x1d   : > { %741 = vmatprep.subr.msk.bf16.mxu0 %vm1012_vm1, %v739_v10  ;;  %v748_v21 = vpack.c.bf16 %v207_v18, %v206_v17  ;;  %v751_v22 = vpack.c.bf16 %v225_v20, %v224_v19  ;;  %v209_v24 = vld [vmem:[%s1008_s7 + $0x38] sm:$0xff]  ;;  %v226_v25 = vld [vmem:[%s1008_s7 + $0xc0] sm:$0xff]  ;;  %v227_v26 = vld [vmem:[%s1008_s7 + $0xc8] sm:$0xff]  ;;  %p856_p12 = pnand %p855_p11, %p987_p5  ;;  %p863_p2 = por %p862_p1, %p861_p0 }
  0x1e   : > { %v754_v27 = vpack.c.bf16 %v209_v24, %v208_v23  ;;  %v757_v28 = vpack.c.bf16 %v227_v26, %v226_v25  ;;  %v210_v29 = vld [vmem:[%s1008_s7 + $0x40] sm:$0xff]  ;;  %v211_v30 = vld [vmem:[%s1008_s7 + $0x48] sm:$0xff]  ;;  %v228_v31 = vld [vmem:[%s1008_s7 + $0xd0] sm:$0xff] }
  0x1f   : > { %v229_v32 = vld [vmem:[%s1008_s7 + $0xd8] sm:$0xff]  ;;  %v760_v33 = vpack.c.bf16 %v211_v30, %v210_v29  ;;  %v212_v35 = vld [vmem:[%s1008_s7 + $0x50] sm:$0xff]  ;;  %v230_v37 = vld [vmem:[%s1008_s7 + $0xe0] sm:$0xff]  ;;  %p857_p13 = pneg %p856_p12 }
  0x20   : > { %v763_v34 = vpack.c.bf16 %v229_v32, %v228_v31  ;;  %v213_v36 = vld [vmem:[%s1008_s7 + $0x58] sm:$0xff]  ;;  %v231_v38 = vld [vmem:[%s1008_s7 + $0xe8] sm:$0xff]  ;;  %v214_v41 = vld [vmem:[%s1008_s7 + $0x60] sm:$0xff] }
  0x21   : > { %v766_v39 = vpack.c.bf16 %v213_v36, %v212_v35  ;;  %v769_v40 = vpack.c.bf16 %v231_v38, %v230_v37  ;;  %v215_v42 = vld [vmem:[%s1008_s7 + $0x68] sm:$0xff]  ;;  %v232_v43 = vld [vmem:[%s1008_s7 + $0xf0] sm:$0xff]  ;;  %v233_v44 = vld [vmem:[%s1008_s7 + $0xf8] sm:$0xff]  ;;  %p864_p3 = pnand %p863_p2, %p857_p13 }
  0x22   : > { %v772_v45 = vpack.c.bf16 %v215_v42, %v214_v41  ;;  %v775_v46 = vpack.c.bf16 %v233_v44, %v232_v43  ;;  %v216_v47 = vld [vmem:[%s1008_s7 + $0x70] sm:$0xff]  ;;  %v217_v48 = vld [vmem:[%s1008_s7 + $0x78] sm:$0xff]  ;;  %v466_v35 = vld [vmem:[%s1158_s2 + $0x8] sm:$0xff]  ;;  %s694_s7 = sshll.u32 %s970_s19, 8  ;;  %s1115_s19 = scalar_lea.sflag [#allocation3], %s189_s29 }
  0x23   : > { %v778_v49 = vpack.c.bf16 %v217_v48, %v216_v47  ;;  %s1113_s10 = scalar_lea.hbm %s1160_s4, %s694_s7 }
  0x24   : > { %744 = vmatpush3.bf16.xpose.msk.msra.mxu0 %vm1012_vm1, %v742_v15 }
  0x25   : > { %747 = vmatprep.subr.msk.bf16.mxu0 %vm1012_vm1, %v745_v16 }
  0x2c   : > { %750 = vmatpush3.bf16.xpose.msk.msra.mxu0 %vm1012_vm1, %v748_v21 }
  0x2d   : > { %753 = vmatprep.subr.msk.bf16.mxu0 %vm1012_vm1, %v751_v22 }
  0x34   : > { %756 = vmatpush3.bf16.xpose.msk.msra.mxu0 %vm1012_vm1, %v754_v27 }
  0x35   : > { %759 = vmatprep.subr.msk.bf16.mxu0 %vm1012_vm1, %v757_v28 }
  0x3c   : > { %762 = vmatpush3.bf16.xpose.msk.msra.mxu0 %vm1012_vm1, %v760_v33 }
  0x3d   : > { %765 = vmatprep.subr.msk.bf16.mxu0 %vm1012_vm1, %v763_v34  ;;  %v465_v34 = vld [vmem:[%s1158_s2] sm:$0xff] }
  0x44   : > { %768 = vmatpush3.bf16.xpose.msk.msra.mxu0 %vm1012_vm1, %v766_v39 }
  0x45   : > { %771 = vmatprep.subr.msk.bf16.mxu0 %vm1012_vm1, %v769_v40 }
  0x4c   : > { %774 = vmatpush3.bf16.xpose.msk.msra.mxu0 %vm1012_vm1, %v772_v45 }
  0x4d   : > { %777 = vmatprep.subr.msk.bf16.mxu0 %vm1012_vm1, %v775_v46 }
  0x54   : > { %780 = vmatpush3.bf16.xpose.msk.msra.mxu0 %vm1012_vm1, %v778_v49 }
  0x5b   : > { %728 = vmatmul.mubr.msk.f32.vlgmr.msra.gmra.mrb[0].mxu0 %vm234_vm0, %v1001_v0 }
  0x5c   : > { %729 = vmatprep.mubr.msk.f32.mxu0 %vm234_vm0, %v200_v50 }
  0x5f   : > { %730 = vmatmul.mubr.msk.f32.gmra.mrb[2].mxu0 %vm234_vm0, %v200_v50 }
  0x60   : > { %731 = vmatprep.mubr.msk.f32.mxu0 %vm234_vm0, %v201_v51 }
  0x63   : > { %732 = vmatmul.mubr.msk.f32.gmra.mrb[4].mxu0 %vm234_vm0, %v201_v51 }
  0x8f   : > { %v554_v36 = vpop.permute.xlu0 %553 }
  0x93   : > { %v559_v41 = vpop.permute.xlu0 %558 }
 0x12e   : > { %v406_v56 = vpop.f32.mrb[0].mxu0 }
 0x12f   : > { %v423_v57 = vsub.f32 0.0, %v406_v56  ;;  %v408_v58 = vpop.f32.mrb[1].mxu0 }
 0x130   : > { %v424_v59 = vsub.f32 0.0, %v408_v58 }
 0x131   : > { %v429_v60 = vmul.f32 1.442695, %v423_v57 }
 0x132   : > { %v431_v61 = vmul.f32 1.442695, %v424_v59  ;;  %v412_v62 = vpop.f32.mrb[2].mxu0 }
 0x133   : > { %830 = vpow2.f32 %v429_v60  ;;  %v425_v63 = vsub.f32 0.0, %v412_v62  ;;  %v414_v0 = vpop.f32.mrb[3].mxu0 }
 0x134   : > { %832 = vpow2.f32 %v431_v61  ;;  %v426_v1 = vsub.f32 0.0, %v414_v0 }
 0x135   : > { %v433_v2 = vmul.f32 1.442695, %v425_v63 }
 0x136   : > { %v435_v3 = vmul.f32 1.442695, %v426_v1  ;;  %v418_v4 = vpop.f32.mrb[4].mxu0 }
 0x137   : > { %834 = vpow2.f32 %v433_v2  ;;  %v427_v5 = vsub.f32 0.0, %v418_v4  ;;  %v420_v6 = vpop.f32.mrb[5].mxu0 }
 0x138   : > { %836 = vpow2.f32 %v435_v3  ;;  %v428_v7 = vsub.f32 0.0, %v420_v6 }
 0x139   : > { %v437_v8 = vmul.f32 1.442695, %v427_v5 }
 0x13a   : > { %v439_v9 = vmul.f32 1.442695, %v428_v7 }
 0x13b   : > { %838 = vpow2.f32 %v437_v8 }
 0x13c   : > { %840 = vpow2.f32 %v439_v9 }
 0x13d   : > { %v831_v10 = vpop.eup %830 }
 0x13e   : > { %v833_v11 = vpop.eup %832  ;;  %v441_v12 = vadd.f32 1.0, %v831_v10 }
 0x13f   : > { %v442_v13 = vadd.f32 1.0, %v833_v11 }
 0x140   : > { %842 = vrcp.f32 %v441_v12 }
 0x141   : > { %v835_v14 = vpop.eup %834  ;;  %844 = vrcp.f32 %v442_v13 }
 0x142   : > { %v837_v15 = vpop.eup %836  ;;  %v443_v16 = vadd.f32 1.0, %v835_v14 }
 0x143   : > { %v444_v17 = vadd.f32 1.0, %v837_v15 }
 0x144   : > { %846 = vrcp.f32 %v443_v16 }
 0x145   : > { %v839_v18 = vpop.eup %838  ;;  %848 = vrcp.f32 %v444_v17 }
 0x146   : > { %v841_v19 = vpop.eup %840  ;;  %v445_v20 = vadd.f32 1.0, %v839_v18 }
 0x147   : > { %v446_v21 = vadd.f32 1.0, %v841_v19 }
 0x148   : > { %850 = vrcp.f32 %v445_v20 }
 0x149   : > { %852 = vrcp.f32 %v446_v21 }
 0x14a   : > { %v843_v22 = vpop.eup %842 }
 0x14b   : > { %v845_v23 = vpop.eup %844 }
 0x14e   : > { %v847_v24 = vpop.eup %846 }
 0x14f   : > { %v849_v25 = vpop.eup %848  ;;  %v459_v26 = vmul.f32 %v847_v24, %v843_v22 }
 0x150   : > { %v460_v27 = vmul.f32 %v849_v25, %v845_v23 }
 0x151   : > { %v783_v28 = vpack.c.bf16 %v459_v26, %v843_v22 }
 0x152   : > { %v851_v29 = vpop.eup %850  ;;  %v781_v30 = vpack.c.bf16 %v460_v27, %v845_v23 }
 0x153   : > { %v853_v31 = vpop.eup %852  ;;  %v461_v32 = vmul.f32 %v851_v29, %v459_v26 }
 0x154   : > { %782 = vmatprep.subr.bf16.mxu1 %v781_v30  ;;  %v462_v33 = vmul.f32 %v853_v31, %v460_v27 }
 0x155   : > { %784 = vmatpush1.bf16.msra.mxu1 %v783_v28 }
 0x156   : > { %478 = vmatprep.subr.mxu1 %v462_v33 }
 0x159   : > { %479 = vmatpush1.msra.mxu1 %v461_v32 }
 0x15a   : > { %687 = vmatmul.mubr.msk.f32.vlgmr.msra.gmra.mrb[0].mxu1 %vm467_vm2, %v465_v34 }
 0x15b   : > { %544 = vmatprep.mubr.f32.mxu1 %v918_v52 }
 0x15e   : > { %688 = vmatmul.mubr.msk.f32.gmra.mrb[2].mxu1 %vm467_vm2, %v466_v35 }
 0x22d   : > { %v540_v37 = vpop.f32.mrb[0].mxu1 }
 0x22e   : > { %v561_v38 = vadd.f32 %v554_v36, %v540_v37  ;;  %v542_v39 = vpop.f32.mrb[1].mxu1 }
 0x22f   : > { %v562_v40 = vadd.f32 %v554_v36, %v542_v39 }
 0x230   : > { %565 = vst [vmem:[%s191_s5] sm:$0xff] %v561_v38 }
 0x231   : > { %566 = vst [vmem:[%s191_s5 + $0x8] sm:$0xff] %v562_v40  ;;  %v546_v42 = vpop.f32.mrb[2].mxu1 }
 0x232   : > { %v563_v43 = vadd.f32 %v559_v41, %v546_v42  ;;  %v548_v44 = vpop.f32.mrb[3].mxu1 }
 0x233   : > { %v564_v45 = vadd.f32 %v559_v41, %v548_v44 }
 0x234   : > { %567 = vst [vmem:[%s191_s5 + $0x10] sm:$0xff] %v563_v43 }
 0x235   : > { %568 = vst [vmem:[%s191_s5 + $0x18] sm:$0xff] %v564_v45 }
 0x236   : > { %867 = shalt.err (!%p864_p3)
}
 0x237   : > { %s868_s20 = scalar_lea.hbm %s1113_s10, 512  ;;  %s872_s27 = scalar_lea.hbm %s1160_s4, 1024 }
 0x238   : > { %p869_p4 = scmp.ne.s32.totalorder %s1113_s10, %s868_s20  ;;  %p873_p9 = scmp.lt.u32.totalorder %s1113_s10, %s1160_s4 }
 0x239   : > { %p874_p10 = scmp.lt.u32.totalorder %s872_s27, %s868_s20  ;;  %p876_p12 = scmp.lt.u32.totalorder %s868_s20, %s1113_s10 }
 0x23a   : > { %p870_p7 = pnand %p869_p4, %p987_p5 }
 0x23b   : > { %p875_p11 = por %p874_p10, %p873_p9 }
 0x23c   : > { %p871_p8 = pneg %p870_p7 }
 0x23d   : > { %p877_p13 = por %p876_p12, %p875_p11 }
 0x23f   : > { %p878_p0 = pnand %p877_p13, %p871_p8 }
 0x241   : > { %881 = shalt.err (!%p878_p0)
}
 0x242   : > { %s921_s30 = smov 256   ;;  %s922_s5 = smov 512  }
 0x243   : > { %s923_s7 = smov 16  }
 0x244   : > { %785 = dma.vmem_to_hbm [thread:$0]  (%p987_p5), %s1108_s6, 512, %s1113_s10, %s1115_s19, %s921_s30, %s922_s5, %s923_s7  }
 0x245 PF: > { %p791_p1 = scmp.ge.s32.totalorder %s916_s18, 2  ;;  %s598_s8 = sand.u32 1, %s904_s15  }
 0x246   : > { %s599_s9 = scalar_lea.sflag [#allocation3], %s598_s8 }
 0x247   : > { %p788_p2 = pnand %p791_p1, %p991_p6 }
 0x249   : > { %899 = dma.done.wait (!%p788_p2), %s599_s9, 512  }
 0x24a   : > { %901 = vsyncadd (!%p788_p2), %s599_s9, 4294966784  ;;  %p14_p3 = scmp.ge.s32.totalorder %s974_s21, 4   ;;  %s1165_s15 = smov %s908_s16 }
 0x24b   : > { %s1166_s16 = smov %s912_s17  ;;  %s1167_s17 = smov %s985_s24 }
 0x24c   : > { %s1168_s18 = smov %s974_s21  ;;  %16 = sbr.rel (!%p14_p3) target bundleno = 3 (0x3), region = 71 }
 0x253   :  { %604 = vsyncpa [#allocation3], 1 }
 0x254   :  { %606 = vsyncpa [#allocation3 + $0x1], 1 }

</bundles_post_ra>
